<compile_context>
chip_gen: v5e
topology: v5e:2x2
jax: 0.10.0
libtpu: 0.0.40
codegen_flags: <defaults>
</compile_context>

<pallas_src>
import functools

import jax
import jax.numpy as jnp
from jax.experimental import pallas as pl
from jax.experimental.pallas import tpu as pltpu


# ----------------------------------------------------------------------------
# Pallas kernel: per-pixel (1x1 conv) backbone + pred head + loc sigmoid
# ----------------------------------------------------------------------------
def _head_kernel(x_ref, wbt_ref, bb_ref, wpt_ref, bp_ref, loc_ref, conf_ref):
    # x_ref   : (C_in, TN)    pixel tile: channels on sublanes, pixels on lanes (bf16)
    # wbt_ref : (C_mid, C_in) synthetic backbone 1x1-conv weight (bf16)
    # bb_ref  : (C_mid, 1)    backbone bias (f32)
    # wpt_ref : (20, C_mid)   pred 1x1-conv weight, rows permuted: 0..15 loc, 16..19 conf (bf16)
    # bp_ref  : (20, 1)       pred bias, same row permutation (f32)
    # loc_ref : (16, TN)      lane-dense sigmoid(loc) output (bf16)
    # conf_ref: (4, TN)       lane-dense raw conf logits (bf16)
    x = x_ref[...]  # already bf16

    # backbone: 1x1 conv + ReLU (pointwise => plain matmul on the MXU,
    # bf16 operands, f32 accumulate).  At C_in=4 the MXU is mostly padding;
    # accepted -- the kernel is HBM-bound, not compute-bound.
    h = jnp.dot(wbt_ref[...], x, preferred_element_type=jnp.float32)
    h = jnp.maximum(h + bb_ref[...], 0.0)

    # pred: 1x1 conv -> 20 channels (f32 accumulate / epilogue; bf16 only at store)
    z = jnp.dot(wpt_ref[...], h.astype(jnp.bfloat16),
                preferred_element_type=jnp.float32) + bp_ref[...]

    # rows 0..15 are loc (sigmoid), rows 16..19 are conf (raw logits);
    # contiguous thanks to the init-time channel permutation, so no iota/where
    # and no discarded sigmoid work.  Both slice offsets are 8-aligned.
    n_loc = loc_ref.shape[0]
    loc_ref[...] = jax.nn.sigmoid(z[:n_loc, :]).astype(loc_ref.dtype)
    conf_ref[...] = z[n_loc:, :].astype(conf_ref.dtype)


@functools.partial(jax.jit, static_argnames=("tn", "out_dtype"))
def _run_head(x, wbt, bb, wpt, bp, *, tn, out_dtype=jnp.bfloat16):
    """x: (B, C_in, HW_pad) bf16 with HW_pad % tn == 0.

    Returns (loc, conf) = ((B, 16, HW_pad), (B, 4, HW_pad)) in out_dtype.
    """
    b, c_in, hw_pad = x.shape
    c_mid = wbt.shape[0]
    c_out = wpt.shape[0]
    n_conf = c_out // 5
    n_loc = c_out - n_conf
    grid = (b, hw_pad // tn)

    n_pix = b * hw_pad
    flops = 2 * n_pix * (c_in * c_mid + c_mid * c_out) + 3 * n_pix * c_out
    bytes_accessed = (
        x.size * x.dtype.itemsize
        + wbt.size * wbt.dtype.itemsize + wpt.size * wpt.dtype.itemsize
        + bb.size * bb.dtype.itemsize + bp.size * bp.dtype.itemsize
        + n_pix * c_out * jnp.dtype(out_dtype).itemsize
    )
    cost = pl.CostEstimate(
        flops=flops,
        transcendentals=n_pix * n_loc,  # sigmoids only on the loc rows now
        bytes_accessed=bytes_accessed,
    )

    # VMEM budget at tn=16384 (bf16): x 128 KiB + loc 512 KiB + conf 128 KiB,
    # double-buffered ~1.5 MiB -- far under the scoped default on every chip.
    # TODO(synk): once a real (wide) backbone is plugged in, re-budget VMEM
    # (2 buffers x tile x dtypes + weights) and set vmem_limit_bytes; v7x has
    # only 64 MiB physical VMEM (32 MiB scoped default) vs 128 MiB on v5e/v6e.
    return pl.pallas_call(
        _head_kernel,
        out_shape=(
            jax.ShapeDtypeStruct((b, n_loc, hw_pad), out_dtype),
            jax.ShapeDtypeStruct((b, n_conf, hw_pad), out_dtype),
        ),
        grid_spec=pltpu.PrefetchScalarGridSpec(
            num_scalar_prefetch=0,
            grid=grid,
            in_specs=[
                pl.BlockSpec((None, c_in, tn), lambda i, j: (i, 0, j)),
                pl.BlockSpec((c_mid, c_in), lambda i, j: (0, 0)),
                pl.BlockSpec((c_mid, 1), lambda i, j: (0, 0)),
                pl.BlockSpec((c_out, c_mid), lambda i, j: (0, 0)),
                pl.BlockSpec((c_out, 1), lambda i, j: (0, 0)),
            ],
            out_specs=[
                pl.BlockSpec((None, n_loc, tn), lambda i, j: (i, 0, j)),
                pl.BlockSpec((None, n_conf, tn), lambda i, j: (i, 0, j)),
            ],
        ),
        compiler_params=pltpu.CompilerParams(
            dimension_semantics=("parallel", "parallel"),
        ),
        cost_estimate=cost,
    )(x, wbt, bb, wpt, bp)


def _pick_tile(hw, batch, tn_max=16384):
    """Lane tile: multiple of 128, as large as possible (hw is padded UP to a
    multiple of the tile afterwards, so no divisor search / collapse to 128).

    For batch==1 we cap the tile at ~hw/2 so there are >=2 pixel tiles and both
    v7x TensorCores get work (v5e/v6e are single-TC, unaffected).
    """
    hw128 = ((hw + 127) // 128) * 128
    tn = min(tn_max, hw128)
    if batch == 1 and hw128 >= 256:
        half = ((hw128 // 2 + 127) // 128) * 128
        tn = min(tn, half)
    return tn


# ----------------------------------------------------------------------------
# Model wrapper (mirrors the PyTorch Model.forward)
# ----------------------------------------------------------------------------
def model_forward(x_nchw, params, *, tn_max=16384, out_dtype=jnp.bfloat16):
    """x_nchw: (B, C_in, H, W).  Returns (loc, conf) like the PyTorch module.

    loc : (B, 4*H*W, 4)   sigmoid-activated box offsets (out_dtype)
    conf: (B, 4*H*W)      raw confidence logits          (out_dtype)
    """
    b, c_in, h, w = x_nchw.shape
    hw = h * w

    # NCHW is already channel-major: flatten spatial dims -> (B, C_in, HW),
    # and feed the kernel bf16 (the kernel computes in bf16/f32-acc anyway).
    x_flat = x_nchw.reshape(b, c_in, hw)
    if x_flat.dtype != jnp.bfloat16:
        x_flat = x_flat.astype(jnp.bfloat16)

    # Pick the lane tile first, then pad the pixel axis up to a multiple of it.
    tn = _pick_tile(hw, b, tn_max)
    n_tiles = -(-hw // tn)
    hw_pad = n_tiles * tn
    if hw_pad != hw:
        x_flat = jnp.pad(x_flat, ((0, 0), (0, 0), (0, hw_pad - hw)))

    loc_k, conf_k = _run_head(x_flat, params["wbt"], params["bb"],
                              params["wpt"], params["bp"],
                              tn=tn, out_dtype=out_dtype)
    # loc_k : (B, 16, HW_pad)   row r = group*4 + slot, already sigmoid'ed
    # conf_k: (B,  4, HW_pad)   row g = group, raw logits

    if hw_pad != hw:
        # padded pixels carry sigmoid(bias) garbage; drop before reshaping
        loc_k = loc_k[:, :, :hw]
        conf_k = conf_k[:, :, :hw]

    # conf: rows are already group-major -> pure (free) reshape, no transpose.
    conf = conf_k.reshape(b, 4 * hw)

    # loc: replicate reshape(B,4,5,HW).permute(0,1,3,2) on the 16 loc channels
    # only, in bf16 (half the bytes the old full-20ch f32 transpose moved).
    loc = loc_k.reshape(b, 4, 4, hw)            # [b, group, slot, pixel]
    loc = jnp.transpose(loc, (0, 1, 3, 2))      # [b, group, pixel, slot]
    loc = loc.reshape(b, 4 * hw, 4)
    return loc, conf


def _channel_perm(c_out=20):
    """Row permutation: new rows 0..15 = loc (group-major, slot-minor),
    new rows 16..19 = conf of each group.  Natural channel = group*5 + slot."""
    n_groups = c_out // 5
    loc = [g * 5 + s for g in range(n_groups) for s in range(4)]
    conf = [g * 5 + 4 for g in range(n_groups)]
    return jnp.asarray(loc + conf, dtype=jnp.int32)


def init_params(key, c_in, c_mid, c_out=20):
    """Deterministic synthetic parameters.

    The PyTorch module takes an arbitrary user-supplied backbone; here we
    instantiate a synthetic backbone = Conv2d(c_in, c_mid, 1) + ReLU so the
    whole forward is well defined.  # TODO(synk): plug in a real backbone.

    Kernel-layout pred weights are row-permuted (loc rows first, conf rows
    last); the natural-order copies are kept only for the pure-JAX reference.
    """
    k0, k1, k2, k3 = jax.random.split(key, 4)
    wbt = (jax.random.normal(k0, (c_mid, c_in), jnp.float32) * 0.1).astype(jnp.bfloat16)
    bb = jax.random.normal(k1, (c_mid, 1), jnp.float32) * 0.1
    wpt_nat = jax.random.normal(k2, (c_out, c_mid), jnp.float32) * 0.1
    bp_nat = jax.random.normal(k3, (c_out, 1), jnp.float32) * 0.1
    perm = _channel_perm(c_out)
    return {
        "wbt": wbt,
        "bb": bb,
        "wpt": wpt_nat[perm].astype(jnp.bfloat16),
        "bp": bp_nat[perm],
        # natural PyTorch channel order, used by the reference only
        "wpt_nat": wpt_nat,
        "bp_nat": bp_nat,
    }


def _reference_forward(x_nchw, params):
    """Pure-JAX reference mirroring the PyTorch module (f32 math, natural order)."""
    b, c_in, h, w = x_nchw.shape
    hw = h * w
    xf = x_nchw.reshape(b, c_in, hw).astype(jnp.float32)
    wbt = params["wbt"].astype(jnp.float32)
    hmid = jnp.maximum(jnp.einsum("mc,bcn->bmn", wbt, xf) + params["bb"][None], 0.0)
    z = jnp.einsum("om,bmn->bon", params["wpt_nat"], hmid) + params["bp_nat"][None]
    z = z.reshape(b, 4, 5, hw).transpose(0, 1, 3, 2).reshape(b, 4 * hw, 5)
    return jax.nn.sigmoid(z[:, :, :4]), z[:, :, 4]


if __name__ == "__main__":
    # small shapes: batch=2, in-channels=4, spatial=16x16, backbone width=8
    B, C_IN, H, W = 2, 4, 16, 16
    C_MID = 8

    key = jax.random.PRNGKey(0)
    k_x, k_p = jax.random.split(key)
    x = jax.random.normal(k_x, (B, C_IN, H, W), jnp.float32)
    params = init_params(k_p, C_IN, C_MID)

    loc, conf = model_forward(x, params)
    jax.block_until_ready((loc, conf))

    assert loc.shape == (B, 4 * H * W, 4), loc.shape
    assert conf.shape == (B, 4 * H * W), conf.shape
    assert bool(jnp.all((loc >= 0.0) & (loc <= 1.0)))

    # correctness vs a pure-JAX f32 reference.  bf16 matmul operands + bf16
    # output storage introduce ~1e-2-level error vs the f32 PyTorch math; the
    # 5e-2 tolerance covers it (verify downstream NMS/decoding tolerates bf16).
    loc_ref, conf_ref = _reference_forward(x, params)
    assert bool(jnp.allclose(loc.astype(jnp.float32), loc_ref, atol=5e-2)), "loc mismatch"
    assert bool(jnp.allclose(conf.astype(jnp.float32), conf_ref, atol=5e-2)), "conf mismatch"

    print("KERNEL_OK")
</pallas_src>

<mosaic_0001>
module attributes {stable_mosaic.version = 11 : i64} {
  func.func @_head_kernel(%arg0: i32, %arg1: i32, %arg2: memref<1x4x256xbf16, #tpu.memory_space<vmem>>, %arg3: memref<8x4xbf16, #tpu.memory_space<vmem>>, %arg4: memref<8x1xf32, #tpu.memory_space<vmem>>, %arg5: memref<20x8xbf16, #tpu.memory_space<vmem>>, %arg6: memref<20x1xf32, #tpu.memory_space<vmem>>, %arg7: memref<1x16x256xbf16, #tpu.memory_space<vmem>>, %arg8: memref<1x4x256xbf16, #tpu.memory_space<vmem>>) attributes {dimension_semantics = [#tpu.dimension_semantics<parallel>, #tpu.dimension_semantics<parallel>], iteration_bounds = array<i64: 2, 1>, scalar_prefetch = 0 : i64, scratch_operands = 0 : i64, tpu.core_type = #tpu.core_type<tc>, window_params = [{transform_indices = @transform_0, window_bounds = array<i64: 1, 4, 256>}, {pipeline_mode = #tpu.pipeline_mode<synchronous>, transform_indices = @transform_1, window_bounds = array<i64: 8, 4>}, {pipeline_mode = #tpu.pipeline_mode<synchronous>, transform_indices = @transform_2, window_bounds = array<i64: 8, 1>}, {pipeline_mode = #tpu.pipeline_mode<synchronous>, transform_indices = @transform_3, window_bounds = array<i64: 20, 8>}, {pipeline_mode = #tpu.pipeline_mode<synchronous>, transform_indices = @transform_4, window_bounds = array<i64: 20, 1>}, {transform_indices = @transform_5, window_bounds = array<i64: 1, 16, 256>}, {transform_indices = @transform_6, window_bounds = array<i64: 1, 4, 256>}]} {
    %c0 = arith.constant 0 : index
    %c0_0 = arith.constant 0 : index
    %c0_1 = arith.constant 0 : index
    %0 = vector.load %arg2[%c0, %c0_0, %c0_1] : memref<1x4x256xbf16, #tpu.memory_space<vmem>>, vector<1x4x256xbf16>
    %1 = vector.shape_cast %0 : vector<1x4x256xbf16> to vector<4x256xbf16>
    %c0_2 = arith.constant 0 : index
    %c0_3 = arith.constant 0 : index
    %2 = vector.load %arg3[%c0_2, %c0_3] : memref<8x4xbf16, #tpu.memory_space<vmem>>, vector<8x4xbf16>
    %cst = arith.constant dense<0.000000e+00> : vector<8x256xf32>
    %3 = tpu.matmul %2, %1, %cst {dimension_numbers = #tpu.dot_dimension_numbers<[1], [0], [0], [1], [0, 0, 1, 1], [], []>} : vector<8x4xbf16>, vector<4x256xbf16>, vector<8x256xf32> -> vector<8x256xf32>
    %c0_4 = arith.constant 0 : index
    %c0_5 = arith.constant 0 : index
    %4 = vector.load %arg4[%c0_4, %c0_5] : memref<8x1xf32, #tpu.memory_space<vmem>>, vector<8x1xf32>
    %5 = vector.broadcast %4 : vector<8x1xf32> to vector<8x256xf32>
    %6 = arith.addf %3, %5 : vector<8x256xf32>
    %cst_6 = arith.constant 0.000000e+00 : f32
    %7 = vector.broadcast %cst_6 : f32 to vector<8x256xf32>
    %8 = arith.maximumf %6, %7 : vector<8x256xf32>
    %c0_7 = arith.constant 0 : index
    %c0_8 = arith.constant 0 : index
    %9 = vector.load %arg5[%c0_7, %c0_8] : memref<20x8xbf16, #tpu.memory_space<vmem>>, vector<20x8xbf16>
    %10 = arith.truncf %8 : vector<8x256xf32> to vector<8x256xbf16>
    %cst_9 = arith.constant dense<0.000000e+00> : vector<20x256xf32>
    %11 = tpu.matmul %9, %10, %cst_9 {dimension_numbers = #tpu.dot_dimension_numbers<[1], [0], [0], [1], [0, 0, 1, 1], [], []>} : vector<20x8xbf16>, vector<8x256xbf16>, vector<20x256xf32> -> vector<20x256xf32>
    %c0_10 = arith.constant 0 : index
    %c0_11 = arith.constant 0 : index
    %12 = vector.load %arg6[%c0_10, %c0_11] : memref<20x1xf32, #tpu.memory_space<vmem>>, vector<20x1xf32>
    %13 = vector.broadcast %12 : vector<20x1xf32> to vector<20x256xf32>
    %14 = arith.addf %11, %13 : vector<20x256xf32>
    %15 = vector.extract_strided_slice %14 {offsets = [0, 0], sizes = [16, 256], strides = [1, 1]} : vector<20x256xf32> to vector<16x256xf32>
    %16 = arith.negf %15 : vector<16x256xf32>
    %17 = math.exp %16 : vector<16x256xf32>
    %cst_12 = arith.constant 1.000000e+00 : f32
    %18 = vector.broadcast %cst_12 : f32 to vector<16x256xf32>
    %19 = arith.addf %18, %17 : vector<16x256xf32>
    %20 = arith.divf %18, %19 : vector<16x256xf32>
    %21 = arith.truncf %20 : vector<16x256xf32> to vector<16x256xbf16>
    %c0_13 = arith.constant 0 : index
    %c0_14 = arith.constant 0 : index
    %c0_15 = arith.constant 0 : index
    %22 = vector.load %arg7[%c0_13, %c0_14, %c0_15] : memref<1x16x256xbf16, #tpu.memory_space<vmem>>, vector<1x16x256xbf16>
    %23 = vector.shape_cast %22 : vector<1x16x256xbf16> to vector<16x256xbf16>
    %24 = vector.shape_cast %21 : vector<16x256xbf16> to vector<1x16x256xbf16>
    tpu.vector_store %arg7[%c0_13, %c0_14, %c0_15], %24 {strides = array<i32>} : memref<1x16x256xbf16, #tpu.memory_space<vmem>>, vector<1x16x256xbf16>,
    %25 = vector.extract_strided_slice %14 {offsets = [16, 0], sizes = [4, 256], strides = [1, 1]} : vector<20x256xf32> to vector<4x256xf32>
    %26 = arith.truncf %25 : vector<4x256xf32> to vector<4x256xbf16>
    %c0_16 = arith.constant 0 : index
    %c0_17 = arith.constant 0 : index
    %c0_18 = arith.constant 0 : index
    %27 = vector.load %arg8[%c0_16, %c0_17, %c0_18] : memref<1x4x256xbf16, #tpu.memory_space<vmem>>, vector<1x4x256xbf16>
    %28 = vector.shape_cast %27 : vector<1x4x256xbf16> to vector<4x256xbf16>
    %29 = vector.shape_cast %26 : vector<4x256xbf16> to vector<1x4x256xbf16>
    tpu.vector_store %arg8[%c0_16, %c0_17, %c0_18], %29 {strides = array<i32>} : memref<1x4x256xbf16, #tpu.memory_space<vmem>>, vector<1x4x256xbf16>,
    return
  }
  func.func @transform_0(%arg0: i32, %arg1: i32) -> (i32, i32, i32) {
    %c0_i32 = arith.constant 0 : i32
    %c0_i32_0 = arith.constant 0 : i32
    return %arg0, %c0_i32, %arg1 : i32, i32, i32
  }
  func.func @transform_1(%arg0: i32, %arg1: i32) -> (i32, i32) {
    %c0_i32 = arith.constant 0 : i32
    %c0_i32_0 = arith.constant 0 : i32
    %c0_i32_1 = arith.constant 0 : i32
    return %c0_i32, %c0_i32_0 : i32, i32
  }
  func.func @transform_2(%arg0: i32, %arg1: i32) -> (i32, i32) {
    %c0_i32 = arith.constant 0 : i32
    %c0_i32_0 = arith.constant 0 : i32
    %c0_i32_1 = arith.constant 0 : i32
    return %c0_i32, %c0_i32_0 : i32, i32
  }
  func.func @transform_3(%arg0: i32, %arg1: i32) -> (i32, i32) {
    %c0_i32 = arith.constant 0 : i32
    %c0_i32_0 = arith.constant 0 : i32
    %c0_i32_1 = arith.constant 0 : i32
    return %c0_i32, %c0_i32_0 : i32, i32
  }
  func.func @transform_4(%arg0: i32, %arg1: i32) -> (i32, i32) {
    %c0_i32 = arith.constant 0 : i32
    %c0_i32_0 = arith.constant 0 : i32
    %c0_i32_1 = arith.constant 0 : i32
    return %c0_i32, %c0_i32_0 : i32, i32
  }
  func.func @transform_5(%arg0: i32, %arg1: i32) -> (i32, i32, i32) {
    %c0_i32 = arith.constant 0 : i32
    %c0_i32_0 = arith.constant 0 : i32
    return %arg0, %c0_i32, %arg1 : i32, i32, i32
  }
  func.func @transform_6(%arg0: i32, %arg1: i32) -> (i32, i32, i32) {
    %c0_i32 = arith.constant 0 : i32
    %c0_i32_0 = arith.constant 0 : i32
    return %arg0, %c0_i32, %arg1 : i32, i32, i32
  }
}

</mosaic_0001>

<bundles_post_ra>
// kernel: _run_head.1
= control target key start
LH: loop header
LB: loop body
LE: loop exit
PB: predicated region body
PF: predicated region fallthrough
CT: control target
= control target key end

     0   :  { %12 = vsyncpa [#allocation3], 0  ;;  %s1113_s0 = inlined_call_operand.vmem [shape: bf16[2,4,256], index: 0, kind: input, shape index: {}]   ;;  %s1114_s1 = inlined_call_operand.vmem [shape: bf16[8,4], index: 1, kind: input, shape index: {}]   ;;  %s1115_s2 = inlined_call_operand.vmem [shape: f32[8,1], index: 2, kind: input, shape index: {}]   ;;  %s1116_s3 = inlined_call_operand.vmem [shape: bf16[20,8], index: 3, kind: input, shape index: {}]   ;;  %s1117_s4 = inlined_call_operand.vmem [shape: f32[20,1], index: 4, kind: input, shape index: {}]   ;;  %s1118_s5 = inlined_call_operand.hbm [shape: bf16[2,16,256], index: 5, kind: output, shape index: {0}]   ;;  %s1119_s6 = inlined_call_operand.hbm [shape: bf16[2,4,256], index: 6, kind: output, shape index: {1}]  }
   0x1   :  { %14 = vsyncpa [#allocation3 + $0x1], 0 }
   0x2   :  { %15 = vsyncpa [#allocation5], 0 }
   0x3   :  { %17 = vsyncpa [#allocation5 + $0x1], 0  ;;  %s935_s21 = smov 0   ;;  %s937_s22 = smov 0  }
   0x4   :  { %s939_s23 = smov 0   ;;  %s941_s24 = smov 0  }
   0x5   :  { %s943_s25 = smov 0   ;;  %s945_s26 = smov 0  }
   0x6 LB: > { %s669_s27 = sadd.s32 4294967295, %s895_s26   ;;  %s670_s28 = sadd.s32 4294967294, %s895_s26   ;;  %s895_s26 = sphi %s945_s26, %s23_s26   ;;  %s891_s25 = sphi %s943_s25, %s1126_s25   ;;  %s887_s24 = sphi %s941_s24, %s1125_s24   ;;  %s883_s23 = sphi %s939_s23, %s1124_s23   ;;  %s879_s22 = sphi %s937_s22, %s1123_s22   ;;  %s875_s21 = sphi %s935_s21, %s1122_s21  }
   0x7   : > { %s35_s29 = sadd.s32 1, %s891_s25  ;;  %s156_s30 = sadd.s32 1, %s883_s23 }
   0x8   : > { %p37_p0 = scmp.ge.s32.totalorder %s35_s29, 2  ;;  %p166_p1 = scmp.ne.s32.totalorder %s883_s23, %s879_s22 }
   0x9   : > { %p167_p2 = scmp.eq.s32.totalorder %s669_s27, 1  ;;  %p172_p3 = scmp.ne.s32.totalorder %s879_s22, %s875_s21 }
   0xa   : > { %s1128_s29 = smov (%p37_p0, %s35_s29), 0  ;;  %p173_p5 = scmp.eq.s32.totalorder %s670_s28, 1 }
   0xb   : > { %p975_p4 = por %p167_p2, %p166_p1  ;;  %s151_s8 = ssub.s32 %s891_s25, %s1128_s29 }
   0xc   : > { %p673_p6 = scmp.ge.s32.totalorder %s895_s26, 1  ;;  %p154_p7 = scmp.eq.s32.totalorder %s151_s8, 0 }
   0xd   : > { %p982_p8 = por %p173_p5, %p172_p3  ;;  %p244_p9 = scmp.lt.s32.totalorder %s895_s26, 3 }
   0xe   : > { %s988_s10 = scalar_select %p154_p7, %s883_s23, %s156_s30  }
   0xf   : > { %p245_p10 = pnand %p673_p6, %p244_p9 }
  0x10   : > { %p284_p11 = scmp.lt.s32.totalorder (!%p245_p10), %s887_s24, 1  ;;  %s1023_s16 = sand.u32 (!%p245_p10), 1, %s879_s22  }
  0x11   : > { %248 = sbr.rel (%p245_p10) target bundleno = 354 (0x162), region = 40  ;;  %s675_s18 = sshll.u32 (!%p245_p10), %s1023_s16, 2 }
  0x12   : > { %s282_s28 = scalar_lea.vmem (!%p245_p10), [#allocation4], %s675_s18  ;;  %s520_s11 = scalar_lea.sflag (!%p245_p10), [#allocation5], %s1023_s16 }
  0x13   : > { %s554_s30 = sshll.u32 (!%p245_p10), %s282_s28, 4  ;;  %s1039_s30 = int_to_ptr.vmem [resolvable:$true] %s554_s30 }
  0x16   : > { %v897_v0 = vmov 0   ;;  %v298_v1 = vld [vmem:[%s1115_s2] sm:$0xff]  ;;  %s285_s13 = scalar_select %p284_p11, %s887_s24, 1  ;;  %vm312_vm0 = vcmask 1041408   ;;  %vm308_vm1 = vcmask 31744   ;;  %v351_v9 = vld [vmem:[%s1117_s4 + $0x8] sm:$0xff] }
  0x17   : > { %767 = vset.pattern.permute.xlu0 %v897_v0  ;;  %768 = vset.pattern.permute.xlu1 %v897_v0  ;;  %v350_v3 = vld [vmem:[%s1117_s4] sm:$0xff]  ;;  %v352_v15 = vld [vmem:[%s1117_s4 + $0x10] sm:$0xf]  ;;  %vm383_vm2 = vcmask 1043456   ;;  %vm376_vm3 = vcmask 64512  }
  0x18   : > { %301 = vperm.xlu0 %767, %v298_v1   ;;  %s700_s14 = sshll.u32 %s285_s13, 2  ;;  %v297_v8 = vld [vmem:[%s1114_s1] sm:$0xf]  ;;  %360 = vperm.xlu1 %768, %v351_v9   ;;  %v347_v25 = vld [vmem:[%s1116_s3 + $0x8] sm:$0x3] }
  0x19   : > { %s291_s17 = scalar_lea.vmem %s1113_s0, %s700_s14  ;;  %v701_v22 = vld [vmem:[%s1116_s3] sm:$0xff]  ;;  %v373_v26 = vunpack.c.l.b16 %v347_v25 }
  0x1a   : > { %v296_v2 = vld [vmem:[%s291_s17] sm:$0xf]  ;;  %s703_s17 = sshll.u32 %s887_s24, 2 }
  0x1b   : > { %305 = vst [vmem:[#allocation1] ss:$4 sm:$0xff] %v296_v2  ;;  %v375_v27 = vpack.c.b16 %v373_v26, %v373_v26  ;;  %s552_s27 = scalar_lea.hbm %s1119_s6, %s703_s17  ;;  %s805_s17 = scalar_lea.hbm %s1119_s6, 8 }
  0x1c   : > { %s556_s8 = sshll.u32 %s552_s27, 4  ;;  %s1041_s8 = int_to_ptr.hbm [resolvable:$true] %s556_s8 }
  0x1d   : > { %s799_s12 = sshra.s32 %s1041_s8, 4  ;;  %s800_s12 = int_to_ptr.hbm [resolvable:$true] %s799_s12 }
  0x1e   : > { %s801_s13 = scalar_lea.hbm %s800_s12, 4  ;;  %p806_p1 = scmp.lt.s32.totalorder %s800_s12, %s1119_s6 }
  0x1f   : > { %p802_p12 = scmp.ne.s32.totalorder %s800_s12, %s801_s13  ;;  %p807_p2 = scmp.lt.s32.totalorder %s805_s17, %s801_s13 }
  0x20   : > { %355 = vperm.xlu0 %767, %v350_v3   ;;  %365 = vperm.xlu1 %768, %v352_v15  }
  0x21   : > { %p803_p13 = pnand %p802_p12, %p975_p4  ;;  %p808_p3 = por %p807_p2, %p806_p1 }
  0x22   : > { %v306_v4 = vld.sshfl [vmem:[#allocation1] sm:$0xff pattern:$0x73625140]  ;;  %v307_v5 = vld.sshfl [vmem:[#allocation1 + $0x8] sm:$0xff pattern:$0x73625140] }
  0x23   : > { %v313_v6 = vsel %vm312_vm0, %v306_v4, 0  ;;  %v315_v7 = vsel %vm312_vm0, %v307_v5, 0  ;;  %p804_p0 = pneg %p803_p13 }
  0x24   : > { %324 = vmatpush.bf16.msra.mxu0 %v313_v6  ;;  %337 = vmatpush.bf16.msra.mxu1 %v315_v7 }
  0x25   : > { %p809_p5 = pnand %p808_p3, %p804_p0 }
  0x27   : > { %678 = vmatmul.msk.bf16.vlgmr.msra.gmra.mxu0 %vm308_vm1, %v297_v8  ;;  %679 = vmatmul.msk.bf16.vlgmr.msra.gmra.mxu1 %vm308_vm1, %v297_v8 }
  0x8a   : > { %v302_v10 = vpop.permute.xlu0 %301  ;;  %v361_v35 = vpop.permute.xlu1 %360 }
  0x92   : > { %v356_v28 = vpop.permute.xlu0 %355  ;;  %v366_v46 = vpop.permute.xlu1 %365 }
  0xa4   : > { %v326_v11 = vpop.f32.mrf.mxu0  ;;  %v339_v12 = vpop.f32.mrf.mxu1 }
  0xa5   : > { %v327_v13 = vadd.f32 %v326_v11, %v302_v10  ;;  %v340_v14 = vadd.f32 %v339_v12, %v302_v10 }
  0xa7   : > { %v343_v16 = vmax.f32 %v327_v13, 0.0  ;;  %v344_v17 = vmax.f32 %v340_v14, 0.0 }
  0xa9   : > { %v348_v18 = vpack.c.bf16 %v343_v16, %v343_v16  ;;  %v349_v19 = vpack.c.bf16 %v344_v17, %v344_v17 }
  0xab   : > { %v385_v20 = vsel %vm383_vm2, %v348_v18, 0  ;;  %v388_v21 = vsel %vm383_vm2, %v349_v19, 0 }
  0xac   : > { %v328_v23 = vpop.f32.mrf.mxu0  ;;  %v341_v24 = vpop.f32.mrf.mxu1  ;;  %397 = vmatpush.bf16.msra.mxu2 %v385_v20  ;;  %415 = vmatpush.bf16.msra.mxu3 %v388_v21 }
  0xaf   : > { %684 = vmatmul.msk.bf16.vlgmr.msra.gmra.mxu2 %vm376_vm3, %v701_v22  ;;  %686 = vmatmul.msk.bf16.vlgmr.msra.gmra.mxu3 %vm376_vm3, %v701_v22 }
  0xbf   : > { %685 = vmatmul.msk.bf16.gmra.mxu2 %vm376_vm3, %v375_v27  ;;  %687 = vmatmul.msk.bf16.gmra.mxu3 %vm376_vm3, %v375_v27 }
 0x132   : > { %v399_v29 = vpop.f32.mrf.mxu2  ;;  %v417_v30 = vpop.f32.mrf.mxu3 }
 0x133   : > { %v400_v31 = vadd.f32 %v399_v29, %v356_v28  ;;  %v418_v32 = vadd.f32 %v417_v30, %v356_v28 }
 0x135   : > { %v688_v33 = vmul.f32 -1.442695, %v400_v31  ;;  %v689_v34 = vmul.f32 -1.442695, %v418_v32 }
 0x137   : > { %769 = vpow2.f32 %v688_v33 }
 0x138   : > { %771 = vpow2.f32 %v689_v34 }
 0x13a   : > { %v401_v36 = vpop.f32.mrf.mxu2  ;;  %v419_v37 = vpop.f32.mrf.mxu3 }
 0x13b   : > { %v402_v38 = vadd.f32 %v401_v36, %v361_v35  ;;  %v420_v39 = vadd.f32 %v419_v37, %v361_v35 }
 0x13d   : > { %v770_v40 = vpop.eup %769  ;;  %v690_v41 = vmul.f32 -1.442695, %v402_v38  ;;  %v691_v44 = vmul.f32 -1.442695, %v420_v39 }
 0x13e   : > { %v772_v42 = vpop.eup %771  ;;  %v1018_v43 = vadd.f32 1.0, %v770_v40 }
 0x13f   : > { %v1020_v45 = vadd.f32 1.0, %v772_v42  ;;  %773 = vpow2.f32 %v690_v41 }
 0x140   : > { %775 = vrcp.f32 %v1018_v43  ;;  %v451_v62 = vand.u32 2147483647, %v1018_v43  ;;  %v453_v63 = vand.u32 2147483648, %v1018_v43 }
 0x141   : > { %777 = vrcp.f32 %v1020_v45  ;;  %v468_v5 = vand.u32 2147483648, %v1020_v45  ;;  %v466_v7 = vand.u32 2147483647, %v1020_v45 }
 0x142   : > { %779 = vpow2.f32 %v691_v44  ;;  %v404_v47 = vpop.f32.mrf.mxu2  ;;  %v422_v48 = vpop.f32.mrf.mxu3 }
 0x143   : > { %v405_v49 = vadd.f32 %v404_v47, %v366_v46  ;;  %v423_v50 = vadd.f32 %v422_v48, %v366_v46 }
 0x145   : > { %v774_v51 = vpop.eup %773  ;;  %v506_v52 = vpack.c.bf16 %v423_v50, %v405_v49 }
 0x146   : > { %v776_v53 = vpop.eup %775  ;;  %v1032_v54 = vadd.f32 1.0, %v774_v51 }
 0x147   : > { %v778_v55 = vpop.eup %777  ;;  %v443_v56 = vmul.f32 %v776_v53, %v1018_v43  ;;  %v508_v57 = vrot.slane %v506_v52, 2  ;;  %vm448_vm4 = vweird.f32 %v776_v53 }
 0x148   : > { %v780_v58 = vpop.eup %779  ;;  %v458_v59 = vmul.f32 %v778_v55, %v1020_v45  ;;  %781 = vrcp.f32 %v1032_v54  ;;  %vm463_vm5 = vweird.f32 %v778_v55 }
 0x149   : > { %v444_v60 = vsub.f32 1.0, %v443_v56  ;;  %v1037_v61 = vadd.f32 1.0, %v780_v58  ;;  %v511_v3 = vsel %vm312_vm0, %v506_v52, %v508_v57 }
 0x14a   : > { %v459_v0 = vsub.f32 1.0, %v458_v59  ;;  %v406_v1 = vpop.f32.mrf.mxu2  ;;  %v424_v2 = vpop.f32.mrf.mxu3  ;;  %513 = vst [vmem:[%s282_s28] sm:$0xf] %v511_v3 }
 0x14b   : > { %v445_v4 = vmul.f32 %v776_v53, %v444_v60  ;;  %783 = vrcp.f32 %v1037_v61 }
 0x14c   : > { %v460_v6 = vmul.f32 %v778_v55, %v459_v0 }
 0x14d   : > { %812 = shalt.err (!%p809_p5)
}
 0x14e   : > { %705 = dma.vmem_to_hbm [thread:$0]  (%p975_p4), %s1039_s30, 64, %s1041_s8, %s520_s11   ;;  %v446_v8 = vadd.f32 %v776_v53, %v445_v4  ;;  %vm447_vm6 = vweird.f32 %v1018_v43  ;;  %v782_v9 = vpop.eup %781  ;;  %v454_v10 = vor.u32 1.1754944e-38, %v453_v63  ;;  %v461_v11 = vadd.f32 %v778_v55, %v460_v6 }
 0x14f   : > { %vm449_vm7 = vmor %vm447_vm6, %vm448_vm4  ;;  %vm462_vm8 = vweird.f32 %v1020_v45  ;;  %s674_s20 = sshll.u32 %s1023_s16, 4  ;;  %vm452_vm9 = vcmp.eq.f32.partialorder %v451_v62, 8.507059e+37  ;;  %v469_v12 = vor.u32 1.1754944e-38, %v468_v5  ;;  %v473_v13 = vmul.f32 %v782_v9, %v1032_v54  ;;  %s702_s27 = sshll.u32 %s887_s24, 4 }
 0x150   : > { %vm464_vm10 = vmor %vm462_vm8, %vm463_vm5  ;;  %v450_v14 = vsel %vm449_vm7, %v776_v53, %v446_v8  ;;  %vm467_vm11 = vcmp.eq.f32.partialorder %v466_v7, 8.507059e+37  ;;  %vm478_vm12 = vweird.f32 %v782_v9  ;;  %v483_v23 = vand.u32 2147483648, %v1032_v54  ;;  %s275_s28 = scalar_lea.vmem [#allocation2], %s674_s20  ;;  %s533_s11 = scalar_lea.hbm %s1118_s5, %s702_s27 }
 0x151   : > { %v455_v15 = vsel %vm452_vm9, %v454_v10, %v450_v14  ;;  %v465_v16 = vsel %vm464_vm10, %v778_v55, %v461_v11  ;;  %v784_v17 = vpop.eup %783  ;;  %v474_v18 = vsub.f32 1.0, %v473_v13  ;;  %v481_v24 = vand.u32 2147483647, %v1032_v54  ;;  %s534_s24 = sshll.u32 %s275_s28, 4  ;;  %s536_s12 = sshll.u32 %s533_s11, 4  ;;  %s535_s24 = int_to_ptr.vmem [resolvable:$true] %s534_s24  ;;  %s537_s12 = int_to_ptr.hbm [resolvable:$true] %s536_s12 }
 0x152   : > { %v470_v19 = vsel %vm467_vm11, %v469_v12, %v465_v16  ;;  %v488_v20 = vmul.f32 %v784_v17, %v1037_v61  ;;  %vm477_vm13 = vweird.f32 %v1032_v54  ;;  %v498_v27 = vand.u32 2147483648, %v1037_v61  ;;  %s515_s13 = scalar_lea.sflag [#allocation3], %s1023_s16  ;;  %s827_s14 = sshra.s32 %s537_s12, 4  ;;  %s828_s14 = int_to_ptr.hbm [resolvable:$true] %s827_s14 }
 0x153   : > { %v502_v21 = vpack.c.bf16 %v470_v19, %v455_v15  ;;  %v475_v22 = vmul.f32 %v782_v9, %v474_v18  ;;  %vm479_vm14 = vmor %vm477_vm13, %vm478_vm12  ;;  %vm493_vm15 = vweird.f32 %v784_v17  ;;  %v496_v29 = vand.u32 2147483647, %v1037_v61  ;;  %s829_s15 = scalar_lea.hbm %s828_s14, 16  ;;  %s833_s19 = scalar_lea.hbm %s1118_s5, 32 }
 0x154   : > { %v489_v25 = vsub.f32 1.0, %v488_v20  ;;  %v484_v30 = vor.u32 1.1754944e-38, %v483_v23  ;;  %vm482_vm0 = vcmp.eq.f32.partialorder %v481_v24, 8.507059e+37  ;;  %vm492_vm1 = vweird.f32 %v1037_v61  ;;  %p830_p6 = scmp.ne.s32.totalorder %s828_s14, %s829_s15  ;;  %p834_p10 = scmp.lt.s32.totalorder %s828_s14, %s1118_s5 }
 0x155   : > { %504 = vst [vmem:[%s275_s28] sm:$0xff] %v502_v21  ;;  %v476_v26 = vadd.f32 %v782_v9, %v475_v22  ;;  %vm494_vm2 = vmor %vm492_vm1, %vm493_vm15  ;;  %v499_v33 = vor.u32 1.1754944e-38, %v498_v27  ;;  %vm497_vm3 = vcmp.eq.f32.partialorder %v496_v29, 8.507059e+37  ;;  %p835_p11 = scmp.lt.s32.totalorder %s833_s19, %s829_s15 }
 0x156   : > { %v490_v28 = vmul.f32 %v784_v17, %v489_v25  ;;  %p831_p7 = pnand %p830_p6, %p975_p4 }
 0x157   : > { %v480_v31 = vsel %vm479_vm14, %v782_v9, %v476_v26  ;;  %p836_p12 = por %p835_p11, %p834_p10 }
 0x158   : > { %v491_v32 = vadd.f32 %v784_v17, %v490_v28  ;;  %v485_v34 = vsel %vm482_vm0, %v484_v30, %v480_v31  ;;  %p832_p9 = pneg %p831_p7 }
 0x15a   : > { %v495_v35 = vsel %vm494_vm2, %v784_v17, %v491_v32  ;;  %p837_p13 = pnand %p836_p12, %p832_p9 }
 0x15b   : > { %v500_v36 = vsel %vm497_vm3, %v499_v33, %v495_v35 }
 0x15c   : > { %v503_v37 = vpack.c.bf16 %v500_v36, %v485_v34 }
 0x15e   : > { %505 = vst [vmem:[%s275_s28 + $0x8] sm:$0xff] %v503_v37 }
 0x15f   : > { %840 = shalt.err (!%p837_p13)
}
 0x160   : > { %s898_s16 = smov 128   ;;  %s899_s28 = smov 8  }
 0x161   : > { %704 = dma.vmem_to_hbm [thread:$0]  (%p975_p4), %s535_s24, 256, %s537_s12, %s515_s13, %s898_s16, %s898_s16, %s899_s28  }
 0x162 PF: > { %p715_p0 = scmp.ge.s32.totalorder %s895_s26, 2  ;;  %s568_s30 = sand.u32 1, %s875_s21  }
 0x163   : > { %s569_s8 = scalar_lea.sflag [#allocation3], %s568_s30 }
 0x164   : > { %p709_p1 = pnand %p715_p0, %p982_p8 }
 0x166   : > { %p710_p2 = pneg %p709_p1 }
 0x168   : > { %866 = dma.done.wait (%p710_p2), %s569_s8, 256  }
 0x169   : > { %868 = vsyncadd (%p710_p2), %s569_s8, 4294967040  ;;  %s579_s11 = scalar_lea.sflag [#allocation5], %s568_s30 }
 0x16a   : > { %870 = dma.done.wait (%p710_p2), %s579_s11, 64  }
 0x16b   : > { %872 = vsyncadd (%p710_p2), %s579_s11, 4294967232  ;;  %s23_s26 = sadd.s32 1, %s895_s26   ;;  %s1122_s21 = smov %s879_s22 }
 0x16c   : > { %p20_p3 = scmp.ge.s32.totalorder %s23_s26, 4   ;;  %s1123_s22 = smov %s883_s23 }
 0x16d   : > { %s1124_s23 = smov %s988_s10  ;;  %s1125_s24 = smov %s891_s25 }
 0x16e   : > { %s1126_s25 = smov %s1128_s29  ;;  %22 = sbr.rel (!%p20_p3) target bundleno = 6 (0x6), region = 92 }
 0x173   :  { %585 = vsyncpa [#allocation3], 1 }
 0x174   :  { %587 = vsyncpa [#allocation3 + $0x1], 1 }
 0x175   :  { %588 = vsyncpa [#allocation5], 1 }
 0x176   :  { %590 = vsyncpa [#allocation5 + $0x1], 1 }

</bundles_post_ra>
